<compile_context>
chip_gen: v7x
topology: tpu7x:2x2x1
jax: 0.10.0
libtpu: 0.0.40
codegen_flags: <defaults>
</compile_context>

<pallas_src>
import functools

import jax
import jax.numpy as jnp
from jax.experimental import pallas as pl
from jax.experimental.pallas import tpu as pltpu


def _channel_attention_kernel(x_ref, w1_ref, b1_ref, w2_ref, b2_ref,
                              o_ref, sum_acc, max_acc, *, hw, t_hw, nb):
    """Grid = (N // nb, num_spatial_tiles). x_ref block: (nb, C, t_hw)."""
    t = pl.program_id(1)
    n_t = pl.num_programs(1)

    @pl.when(t == 0)
    def _init():
        sum_acc[...] = jnp.zeros_like(sum_acc)
        max_acc[...] = jnp.full_like(max_acc, -jnp.inf)

    x = x_ref[...]  # (nb, C, t_hw), native dtype (no full f32 copy of the block)

    if hw % t_hw != 0:
        # A partial last tile exists.  Keep full tiles on the cheap path and
        # only pay for the iota + where mask on the final tile (padded DMA
        # contents are undefined).  Static gate -> zero cost when HW % t_hw == 0.
        @pl.when(t != n_t - 1)
        def _full_tiles():
            sum_acc[...] += jnp.sum(x, axis=-1, dtype=jnp.float32)
            max_acc[...] = jnp.maximum(
                max_acc[...], jnp.max(x, axis=-1).astype(jnp.float32))

        @pl.when(t == n_t - 1)
        def _masked_tail():
            pos = t * t_hw + jax.lax.broadcasted_iota(jnp.int32, x.shape, 2)
            valid = pos < hw
            sum_acc[...] += jnp.sum(jnp.where(valid, x, 0), axis=-1,
                                    dtype=jnp.float32)
            max_acc[...] = jnp.maximum(
                max_acc[...],
                jnp.max(jnp.where(valid, x, -jnp.inf), axis=-1)
                .astype(jnp.float32))
    else:
        sum_acc[...] += jnp.sum(x, axis=-1, dtype=jnp.float32)
        max_acc[...] = jnp.maximum(
            max_acc[...], jnp.max(x, axis=-1).astype(jnp.float32))

    @pl.when(t == n_t - 1)
    def _finalize():
        avg = sum_acc[...] * (1.0 / hw)                    # (nb, C)
        mx = max_acc[...]                                  # (nb, C)
        # Stack avg rows then max rows -> one MXU pass with M = 2*nb.
        pooled = jnp.concatenate([avg, mx], axis=0)        # (2*nb, C)

        w1 = w1_ref[...].astype(jnp.float32)               # (C, Hd)
        b1 = b1_ref[...].astype(jnp.float32)               # (1, Hd)
        w2 = w2_ref[...].astype(jnp.float32)               # (Hd, C)
        b2 = b2_ref[...].astype(jnp.float32)               # (1, C)

        h = jnp.dot(pooled, w1, preferred_element_type=jnp.float32) + b1
        h = jnp.maximum(h, 0.0)                            # ReLU
        y = jnp.dot(h, w2, preferred_element_type=jnp.float32)     # (2*nb, C)
        # mlp(avg) + mlp(max) == y_avg + y_max + 2*b2
        out = y[:nb] + y[nb:] + 2.0 * b2                   # (nb, C)
        o_ref[...] = jax.nn.sigmoid(out)[:, None, :].astype(o_ref.dtype)


def _hw_budgets():
    """(per-x-buffer tile byte target, pipeline vmem_limit_bytes), generation aware.

    v7x has 64 MiB VMEM per TensorCore -> keep 2x(x tile) + weights + scratch
    well under ~48 MiB.  v5e/v6e have 128 MiB -> larger tiles and a 64 MiB limit.
    """
    cap = 128 << 20
    try:
        cap = int(getattr(pltpu.get_tpu_info(), "vmem_capacity_bytes", cap))
    except Exception:
        pass
    if cap <= (64 << 20):            # v7x-class
        return 12 << 20, 48 << 20
    return 16 << 20, 64 << 20        # v5e / v6e


def _pick_batch_pack(n, per_elem_bytes, target_bytes):
    """Batch elements per grid step.

    Amortizes the ~0.35 us per-step overhead for small feature maps while
    keeping >= 2 blocks on the leading 'parallel' axis (v7x megacore) and
    keeping nb a divisor of N (no out-of-bounds batch blocks).
    """
    if n <= 1:
        return 1
    budget = max(1, target_bytes // max(1, per_elem_bytes))
    best = 1
    for nb in range(1, n // 2 + 1):          # n // nb >= 2 guaranteed
        if n % nb == 0 and nb <= budget:
            best = nb
    return best


def _pick_spatial_tile(hw, row_bytes, target_bytes):
    """Largest lane-aligned spatial tile within the byte target.

    Prefers a tile that divides HW exactly (masked remainder path never
    traced); falls back to a 512-lane-aligned tile plus a masked last tile.
    """
    t_max = (target_bytes // max(1, row_bytes)) // 128 * 128
    t_max = max(128, int(t_max))
    if hw <= t_max:
        return hw                     # single full-extent tile, no masking
    for t in range(t_max, 127, -128):
        if hw % t == 0:
            return t
    return max(512, t_max // 512 * 512) if t_max >= 512 else t_max


def channel_attention_scale(x, w1, b1, w2, b2, *, spatial_tile=None,
                            batch_tile=None):
    """Returns only the (N, C) sigmoid channel-attention scale."""
    N, C, H, W = x.shape
    HW = H * W
    Hd = w1.shape[1]
    assert jnp.issubdtype(x.dtype, jnp.floating), (
        "ChannelAttention kernel assumes floating-point inputs")
    itemsize = jnp.dtype(x.dtype).itemsize

    tile_budget, vmem_limit = _hw_budgets()

    nb = batch_tile if batch_tile is not None else _pick_batch_pack(
        N, C * HW * itemsize, tile_budget)
    assert N % nb == 0, "batch_tile must divide N"
    t_hw = spatial_tile if spatial_tile is not None else _pick_spatial_tile(
        HW, nb * C * itemsize, tile_budget)
    n_t = pl.cdiv(HW, t_hw)

    x_flat = x.reshape(N, C, HW)
    kernel = functools.partial(_channel_attention_kernel,
                               hw=HW, t_hw=t_hw, nb=nb)

    scale = pl.pallas_call(
        kernel,
        out_shape=jax.ShapeDtypeStruct((N, 1, C), x.dtype),
        grid_spec=pltpu.PrefetchScalarGridSpec(
            num_scalar_prefetch=0,
            grid=(N // nb, n_t),
            in_specs=[
                pl.BlockSpec((nb, C, t_hw), lambda b, t: (b, 0, t)),
                pl.BlockSpec((C, Hd), lambda b, t: (0, 0)),
                pl.BlockSpec((1, Hd), lambda b, t: (0, 0)),
                pl.BlockSpec((Hd, C), lambda b, t: (0, 0)),
                pl.BlockSpec((1, C), lambda b, t: (0, 0)),
            ],
            out_specs=pl.BlockSpec((nb, 1, C), lambda b, t: (b, 0, 0)),
            scratch_shapes=[
                pltpu.VMEM((nb, C), jnp.float32),   # running sum (f32)
                pltpu.VMEM((nb, C), jnp.float32),   # running max
            ],
        ),
        compiler_params=pltpu.CompilerParams(
            dimension_semantics=("parallel", "arbitrary"),
            vmem_limit_bytes=vmem_limit,
        ),
    )(x_flat, w1, b1, w2, b2)

    return scale.reshape(N, C)


@functools.partial(jax.jit, static_argnames=("spatial_tile", "batch_tile"))
def channel_attention(x, w1, b1, w2, b2, *, spatial_tile=None, batch_tile=None):
    """x: (N, C, H, W). Returns the expanded (N, C, H, W) attention map.

    The kernel only emits the (N, C) scale; the expand_as is a plain XLA
    broadcast (a stride-0 view in PyTorch) that fuses into any consumer.
    """
    scale = channel_attention_scale(x, w1, b1, w2, b2,
                                    spatial_tile=spatial_tile,
                                    batch_tile=batch_tile)
    return jnp.broadcast_to(scale[:, :, None, None], x.shape).astype(x.dtype)


def _reference(x, w1, b1, w2, b2):
    xf = x.astype(jnp.float32)
    avg = jnp.mean(xf, axis=(2, 3))
    mx = jnp.max(xf, axis=(2, 3))

    def mlp(v):
        h = jnp.maximum(v @ w1 + b1, 0.0)
        return h @ w2 + b2

    out = jax.nn.sigmoid(mlp(avg) + mlp(mx))
    return jnp.broadcast_to(out[:, :, None, None], x.shape).astype(x.dtype)


if __name__ == "__main__":
    # Small shapes consistent with the module: in_planes=32, ratio=4 -> hidden=8
    N, C, ratio = 2, 32, 4
    Hd = C // ratio

    key = jax.random.PRNGKey(0)
    kx, kw1, kb1, kw2, kb2, kx2, kx3 = jax.random.split(key, 7)

    w1 = jax.random.normal(kw1, (C, Hd), dtype=jnp.float32) * (1.0 / C) ** 0.5
    b1 = jax.random.normal(kb1, (1, Hd), dtype=jnp.float32) * 0.01
    w2 = jax.random.normal(kw2, (Hd, C), dtype=jnp.float32) * (1.0 / Hd) ** 0.5
    b2 = jax.random.normal(kb2, (1, C), dtype=jnp.float32) * 0.01

    # Case 1: spatial extent fits a single lane-aligned tile (H*W = 256).
    x1 = jax.random.normal(kx, (N, C, 16, 16), dtype=jnp.float32)
    out1 = jax.block_until_ready(channel_attention(x1, w1, b1, w2, b2))
    ref1 = _reference(x1, w1, b1, w2, b2)
    assert out1.shape == x1.shape
    assert jnp.allclose(out1, ref1, atol=1e-5, rtol=1e-5)

    # Case 2: forced tiled path with masked remainder (H*W = 400, tile = 128).
    x2 = jax.random.normal(kx2, (N, C, 20, 20), dtype=jnp.float32)
    out2 = jax.block_until_ready(
        channel_attention(x2, w1, b1, w2, b2, spatial_tile=128))
    ref2 = _reference(x2, w1, b1, w2, b2)
    assert out2.shape == x2.shape
    assert jnp.allclose(out2, ref2, atol=1e-5, rtol=1e-5)

    # Case 3: batch-packing path (N=4, small maps -> 2 batch elements / step,
    # keeping 2 blocks on the parallel axis).
    x3 = jax.random.normal(kx3, (4, C, 8, 8), dtype=jnp.float32)
    out3 = jax.block_until_ready(channel_attention(x3, w1, b1, w2, b2))
    ref3 = _reference(x3, w1, b1, w2, b2)
    assert out3.shape == x3.shape
    assert jnp.allclose(out3, ref3, atol=1e-5, rtol=1e-5)

    print("KERNEL_OK")
</pallas_src>

<mosaic_0001>
module attributes {stable_mosaic.version = 11 : i64} {
  func.func @_channel_attention_kernel(%arg0: i32, %arg1: i32, %arg2: memref<1x32x256xf32, #tpu.memory_space<vmem>>, %arg3: memref<32x8xf32, #tpu.memory_space<vmem>>, %arg4: memref<1x8xf32, #tpu.memory_space<vmem>>, %arg5: memref<8x32xf32, #tpu.memory_space<vmem>>, %arg6: memref<1x32xf32, #tpu.memory_space<vmem>>, %arg7: memref<1x1x32xf32, #tpu.memory_space<vmem>>, %arg8: memref<1x32xf32, #tpu.memory_space<vmem>>, %arg9: memref<1x32xf32, #tpu.memory_space<vmem>>) attributes {dimension_semantics = [#tpu.dimension_semantics<parallel>, #tpu.dimension_semantics<arbitrary>], iteration_bounds = array<i64: 2, 1>, scalar_prefetch = 0 : i64, scratch_operands = 2 : i64, tpu.core_type = #tpu.core_type<tc>, window_params = [{transform_indices = @transform_0, window_bounds = array<i64: 1, 32, 256>}, {pipeline_mode = #tpu.pipeline_mode<synchronous>, transform_indices = @transform_1, window_bounds = array<i64: 32, 8>}, {pipeline_mode = #tpu.pipeline_mode<synchronous>, transform_indices = @transform_2, window_bounds = array<i64: 1, 8>}, {pipeline_mode = #tpu.pipeline_mode<synchronous>, transform_indices = @transform_3, window_bounds = array<i64: 8, 32>}, {pipeline_mode = #tpu.pipeline_mode<synchronous>, transform_indices = @transform_4, window_bounds = array<i64: 1, 32>}, {transform_indices = @transform_5, window_bounds = array<i64: 1, 1, 32>}]} {
    %c0_i32 = arith.constant 0 : i32
    %0 = arith.cmpi eq, %arg1, %c0_i32 : i32
    %1 = arith.extui %0 : i1 to i32
    %c0_i32_0 = arith.constant 0 : i32
    %2 = arith.cmpi ne, %1, %c0_i32_0 : i32
    scf.if %2 {
      %cst_14 = arith.constant 0.000000e+00 : f32
      %15 = vector.broadcast %cst_14 : f32 to vector<1x32xf32>
      %c0_15 = arith.constant 0 : index
      %c0_16 = arith.constant 0 : index
      %16 = vector.load %arg8[%c0_15, %c0_16] : memref<1x32xf32, #tpu.memory_space<vmem>>, vector<1x32xf32>
      tpu.vector_store %arg8[%c0_15, %c0_16], %15 {strides = array<i32>} : memref<1x32xf32, #tpu.memory_space<vmem>>, vector<1x32xf32>,
      %cst_17 = arith.constant 0xFF800000 : f32
      %17 = vector.broadcast %cst_17 : f32 to vector<1x32xf32>
      %c0_18 = arith.constant 0 : index
      %c0_19 = arith.constant 0 : index
      %18 = vector.load %arg9[%c0_18, %c0_19] : memref<1x32xf32, #tpu.memory_space<vmem>>, vector<1x32xf32>
      tpu.vector_store %arg9[%c0_18, %c0_19], %17 {strides = array<i32>} : memref<1x32xf32, #tpu.memory_space<vmem>>, vector<1x32xf32>,
    } else {
    }
    %c0 = arith.constant 0 : index
    %c0_1 = arith.constant 0 : index
    %c0_2 = arith.constant 0 : index
    %3 = vector.load %arg2[%c0, %c0_1, %c0_2] : memref<1x32x256xf32, #tpu.memory_space<vmem>>, vector<1x32x256xf32>
    %c0_3 = arith.constant 0 : index
    %c0_4 = arith.constant 0 : index
    %4 = vector.load %arg8[%c0_3, %c0_4] : memref<1x32xf32, #tpu.memory_space<vmem>>, vector<1x32xf32>
    %cst = arith.constant dense<0.000000e+00> : vector<1x32xf32>
    %5 = vector.multi_reduction <add>, %3, %cst [2] : vector<1x32x256xf32> to vector<1x32xf32>
    %6 = arith.addf %4, %5 : vector<1x32xf32>
    %c0_5 = arith.constant 0 : index
    %c0_6 = arith.constant 0 : index
    %7 = vector.load %arg8[%c0_5, %c0_6] : memref<1x32xf32, #tpu.memory_space<vmem>>, vector<1x32xf32>
    tpu.vector_store %arg8[%c0_5, %c0_6], %6 {strides = array<i32>} : memref<1x32xf32, #tpu.memory_space<vmem>>, vector<1x32xf32>,
    %c0_7 = arith.constant 0 : index
    %c0_8 = arith.constant 0 : index
    %8 = vector.load %arg9[%c0_7, %c0_8] : memref<1x32xf32, #tpu.memory_space<vmem>>, vector<1x32xf32>
    %cst_9 = arith.constant dense<0xFF800000> : vector<1x32xf32>
    %9 = vector.multi_reduction <maximumf>, %3, %cst_9 [2] : vector<1x32x256xf32> to vector<1x32xf32>
    %10 = arith.maximumf %8, %9 : vector<1x32xf32>
    %c0_10 = arith.constant 0 : index
    %c0_11 = arith.constant 0 : index
    %11 = vector.load %arg9[%c0_10, %c0_11] : memref<1x32xf32, #tpu.memory_space<vmem>>, vector<1x32xf32>
    tpu.vector_store %arg9[%c0_10, %c0_11], %10 {strides = array<i32>} : memref<1x32xf32, #tpu.memory_space<vmem>>, vector<1x32xf32>,
    %c0_i32_12 = arith.constant 0 : i32
    %12 = arith.cmpi eq, %arg1, %c0_i32_12 : i32
    %13 = arith.extui %12 : i1 to i32
    %c0_i32_13 = arith.constant 0 : i32
    %14 = arith.cmpi ne, %13, %c0_i32_13 : i32
    scf.if %14 {
      %c0_14 = arith.constant 0 : index
      %c0_15 = arith.constant 0 : index
      %15 = vector.load %arg8[%c0_14, %c0_15] : memref<1x32xf32, #tpu.memory_space<vmem>>, vector<1x32xf32>
      %cst_16 = arith.constant 3.906250e-03 : f32
      %16 = vector.broadcast %cst_16 : f32 to vector<1x32xf32>
      %17 = arith.mulf %15, %16 : vector<1x32xf32>
      %c0_17 = arith.constant 0 : index
      %c0_18 = arith.constant 0 : index
      %18 = vector.load %arg9[%c0_17, %c0_18] : memref<1x32xf32, #tpu.memory_space<vmem>>, vector<1x32xf32>
      %19 = tpu.concatenate %17, %18 in 0 : vector<1x32xf32>, vector<1x32xf32> -> vector<2x32xf32>
      %c0_19 = arith.constant 0 : index
      %c0_20 = arith.constant 0 : index
      %20 = vector.load %arg3[%c0_19, %c0_20] : memref<32x8xf32, #tpu.memory_space<vmem>>, vector<32x8xf32>
      %c0_21 = arith.constant 0 : index
      %c0_22 = arith.constant 0 : index
      %21 = vector.load %arg4[%c0_21, %c0_22] : memref<1x8xf32, #tpu.memory_space<vmem>>, vector<1x8xf32>
      %c0_23 = arith.constant 0 : index
      %c0_24 = arith.constant 0 : index
      %22 = vector.load %arg5[%c0_23, %c0_24] : memref<8x32xf32, #tpu.memory_space<vmem>>, vector<8x32xf32>
      %c0_25 = arith.constant 0 : index
      %c0_26 = arith.constant 0 : index
      %23 = vector.load %arg6[%c0_25, %c0_26] : memref<1x32xf32, #tpu.memory_space<vmem>>, vector<1x32xf32>
      %cst_27 = arith.constant dense<0.000000e+00> : vector<2x8xf32>
      %24 = tpu.matmul %19, %20, %cst_27 {dimension_numbers = #tpu.dot_dimension_numbers<[1], [0], [0], [1], [0, 0, 1, 1], [], []>} : vector<2x32xf32>, vector<32x8xf32>, vector<2x8xf32> -> vector<2x8xf32>
      %25 = vector.broadcast %21 : vector<1x8xf32> to vector<2x8xf32>
      %26 = arith.addf %24, %25 : vector<2x8xf32>
      %cst_28 = arith.constant 0.000000e+00 : f32
      %27 = vector.broadcast %cst_28 : f32 to vector<2x8xf32>
      %28 = arith.maximumf %26, %27 : vector<2x8xf32>
      %cst_29 = arith.constant dense<0.000000e+00> : vector<2x32xf32>
      %29 = tpu.matmul %28, %22, %cst_29 {dimension_numbers = #tpu.dot_dimension_numbers<[1], [0], [0], [1], [0, 0, 1, 1], [], []>} : vector<2x8xf32>, vector<8x32xf32>, vector<2x32xf32> -> vector<2x32xf32>
      %30 = vector.extract_strided_slice %29 {offsets = [0, 0], sizes = [1, 32], strides = [1, 1]} : vector<2x32xf32> to vector<1x32xf32>
      %31 = vector.extract_strided_slice %29 {offsets = [1, 0], sizes = [1, 32], strides = [1, 1]} : vector<2x32xf32> to vector<1x32xf32>
      %32 = arith.addf %30, %31 : vector<1x32xf32>
      %cst_30 = arith.constant 2.000000e+00 : f32
      %33 = vector.broadcast %cst_30 : f32 to vector<1x32xf32>
      %34 = arith.mulf %33, %23 : vector<1x32xf32>
      %35 = arith.addf %32, %34 : vector<1x32xf32>
      %36 = arith.negf %35 : vector<1x32xf32>
      %37 = math.exp %36 : vector<1x32xf32>
      %cst_31 = arith.constant 1.000000e+00 : f32
      %38 = vector.broadcast %cst_31 : f32 to vector<1x32xf32>
      %39 = arith.addf %38, %37 : vector<1x32xf32>
      %40 = arith.divf %38, %39 : vector<1x32xf32>
      %41 = vector.shape_cast %40 : vector<1x32xf32> to vector<1x1x32xf32>
      %c0_32 = arith.constant 0 : index
      %c0_33 = arith.constant 0 : index
      %c0_34 = arith.constant 0 : index
      %42 = vector.load %arg7[%c0_32, %c0_33, %c0_34] : memref<1x1x32xf32, #tpu.memory_space<vmem>>, vector<1x1x32xf32>
      tpu.vector_store %arg7[%c0_32, %c0_33, %c0_34], %41 {strides = array<i32>} : memref<1x1x32xf32, #tpu.memory_space<vmem>>, vector<1x1x32xf32>,
    } else {
    }
    return
  }
  func.func @transform_0(%arg0: i32, %arg1: i32) -> (i32, i32, i32) {
    %c0_i32 = arith.constant 0 : i32
    %c0_i32_0 = arith.constant 0 : i32
    return %arg0, %c0_i32, %arg1 : i32, i32, i32
  }
  func.func @transform_1(%arg0: i32, %arg1: i32) -> (i32, i32) {
    %c0_i32 = arith.constant 0 : i32
    %c0_i32_0 = arith.constant 0 : i32
    %c0_i32_1 = arith.constant 0 : i32
    return %c0_i32, %c0_i32_0 : i32, i32
  }
  func.func @transform_2(%arg0: i32, %arg1: i32) -> (i32, i32) {
    %c0_i32 = arith.constant 0 : i32
    %c0_i32_0 = arith.constant 0 : i32
    %c0_i32_1 = arith.constant 0 : i32
    return %c0_i32, %c0_i32_0 : i32, i32
  }
  func.func @transform_3(%arg0: i32, %arg1: i32) -> (i32, i32) {
    %c0_i32 = arith.constant 0 : i32
    %c0_i32_0 = arith.constant 0 : i32
    %c0_i32_1 = arith.constant 0 : i32
    return %c0_i32, %c0_i32_0 : i32, i32
  }
  func.func @transform_4(%arg0: i32, %arg1: i32) -> (i32, i32) {
    %c0_i32 = arith.constant 0 : i32
    %c0_i32_0 = arith.constant 0 : i32
    %c0_i32_1 = arith.constant 0 : i32
    return %c0_i32, %c0_i32_0 : i32, i32
  }
  func.func @transform_5(%arg0: i32, %arg1: i32) -> (i32, i32, i32) {
    %c0_i32 = arith.constant 0 : i32
    %c0_i32_0 = arith.constant 0 : i32
    %c0_i32_1 = arith.constant 0 : i32
    return %arg0, %c0_i32, %c0_i32_0 : i32, i32, i32
  }
}

</mosaic_0001>

<bundles_post_ra>
// kernel: channel_attention.1
= control target key start
LH: loop header
LB: loop body
LE: loop exit
PB: predicated region body
PF: predicated region fallthrough
CT: control target
= control target key end

     0   :  { %10 = vsyncpa [#allocation5], 0  ;;  %s2343_s0 = inlined_call_operand.hbm [shape: f32[2,32,256], index: 0, kind: input, shape index: {}]   ;;  %s2344_s1 = inlined_call_operand.hbm [shape: f32[32,8], index: 1, kind: input, shape index: {}]   ;;  %s2345_s2 = inlined_call_operand.hbm [shape: f32[1,8], index: 2, kind: input, shape index: {}]   ;;  %s2346_s3 = inlined_call_operand.hbm [shape: f32[8,32], index: 3, kind: input, shape index: {}]   ;;  %s2347_s4 = inlined_call_operand.hbm [shape: f32[1,32], index: 4, kind: input, shape index: {}]   ;;  %s2348_s5 = inlined_call_operand.hbm [shape: f32[2,1,32], index: 5, kind: output, shape index: {}]  }
   0x1   :  { %12 = vsyncpa [#allocation5 + $0x1], 0 }
   0x2   :  { %13 = vsyncpa [#allocation8], 0 }
   0x3   :  { %14 = vsyncpa [#allocation11], 0 }
   0x4   :  { %15 = vsyncpa [#allocation6], 0 }
   0x5   :  { %17 = vsyncpa [#allocation6 + $0x1], 0  ;;  %s1884_s18 = smov 0   ;;  %s1886_s19 = smov 0  }
   0x6   :  { %s1888_s20 = smov 0   ;;  %s1890_s21 = smov 0  }
   0x7   :  { %s1892_s22 = smov 0   ;;  %s1894_s23 = smov 0  }
   0x8 LB: > { %2355 = sst [smem:[#allocation18_spill]] %s1816_s18  ;;  %s1430_s24 = sadd.s32 4294967295, %s1836_s23   ;;  %s1836_s23 = sphi %s1894_s23, %s23_s23   ;;  %s1832_s22 = sphi %s1892_s22, %s2378_s22   ;;  %s1828_s21 = sphi %s1890_s21, %s2377_s21   ;;  %s1824_s20 = sphi %s1888_s20, %s2376_s20   ;;  %s1820_s19 = sphi %s1886_s19, %s2375_s19   ;;  %s1816_s18 = sphi %s1884_s18, %s2374_s18  }
   0x9   : > { %s1431_s25 = sadd.s32 4294967294, %s1836_s23   ;;  %p57_p0 = scmp.ne.s32.totalorder %s1820_s19, %s1816_s18 }
   0xa   : > { %p1918_p1 = scmp.eq.s32.totalorder %s1430_s24, 0  ;;  %p1922_p2 = scmp.eq.s32.totalorder %s1430_s24, 1 }
   0xb   : > { %p171_p3 = scmp.eq.s32.totalorder %s1431_s25, 1  ;;  %p1432_p5 = scmp.ge.s32.totalorder %s1836_s23, 1 }
   0xc   : > { %s2356_s26 = scalar_select %p1918_p1, 1, 0 }
   0xd   : > { %s2357_s27 = scalar_select %p1922_p2, 1, 0 }
   0xe   : > { %p1928_p4 = por %p1918_p1, %p57_p0  ;;  %p1933_p6 = por %p171_p3, %p57_p0 }
   0xf   : > { %p178_p7 = scmp.lt.s32.totalorder %s1836_s23, 3  ;;  %s1838_s6 = smov [#allocation7]  }
  0x10   : > { %s2358_s28 = scalar_select %p1928_p4, 1, 0 }
  0x11   : > { %s2359_s29 = scalar_select %p1933_p6, 1, 0 }
  0x12   : > { %p1938_p8 = pnand %p1432_p5, %p178_p7  ;;  %s190_s7 = sshll.u32 %s1838_s6, 4  ;;  %s1942_s7 = int_to_ptr.vmem [resolvable:$true] %s190_s7 }
  0x13   : > { %2360 = sst [smem:[#allocation19_spill]] %s2359_s29  ;;  %s1839_s9 = smov [#allocation10]  }
  0x14   : > { %s2361_s30 = scalar_select %p1938_p8, 1, 0 }
  0x15   : > { %p1505_p9 = pneg %p1938_p8  ;;  %s215_s10 = sshll.u32 %s1839_s9, 4  ;;  %s1953_s10 = int_to_ptr.vmem [resolvable:$true] %s215_s10 }
  0x16   : > { %s1840_s11 = smov [#allocation9]   ;;  %s1604_s15 = scalar_lea.hbm %s2344_s1, 512 }
  0x17   : > { %p1949_p11 = pnand %p1505_p9, %p1918_p1  ;;  %s1955_s12 = sshll.u32 %s1840_s11, 4  ;;  %s205_s12 = int_to_ptr.vmem [resolvable:$true] %s1955_s12 }
  0x18   : > { %p1605_p12 = scmp.ne.s32.totalorder %s2344_s1, %s1604_s15  ;;  %p1611_p5 = scmp.lt.u32.totalorder %s1604_s15, %s2344_s1 }
  0x19   : > { %p1965_p13 = pneg %p1949_p11 }
  0x1b   : > { %p1607_p0 = pnand %p1965_p13, %p1605_p12 }
  0x1d   : > { %p1608_p3 = pneg %p1607_p0 }
  0x1f   : > { %p1613_p7 = pnand %p1611_p5, %p1608_p3 }
  0x21   : > { %1616 = shalt.err (!%p1613_p7)
}
  0x22   : > { %s1617_s9 = scalar_lea.vmem %s1942_s7, 512  ;;  %p1625_p1 = scmp.lt.s32.totalorder %s1942_s7, %s1942_s7 }
  0x23   : > { %p1618_p9 = scmp.ne.s32.totalorder %s1942_s7, %s1617_s9  ;;  %p1626_p4 = scmp.lt.s32.totalorder %s1617_s9, %s1617_s9 }
  0x25   : > { %p1620_p10 = pnand %p1618_p9, %p1965_p13  ;;  %p1627_p12 = por %p1626_p4, %p1625_p1 }
  0x27   : > { %p1621_p6 = pneg %p1620_p10 }
  0x29   : > { %p1628_p0 = pnand %p1627_p12, %p1621_p6 }
  0x2b   : > { %1631 = shalt.err (!%p1628_p0)
}
  0x2c   : > { %s1841_s11 = smov 128   ;;  %s1842_s13 = smov 8  }
  0x2d   : > { %1508 = dma.hbm_to_vmem [thread:$0]  (!%p1949_p11), %s2344_s1, 512, %s1942_s7, [#allocation8], %s1841_s11, %s1841_s11, %s1842_s13  }
  0x2e   : > { %s1632_s25 = scalar_lea.hbm %s2346_s3, 128 }
  0x2f   : > { %p1633_p1 = scmp.ne.s32.totalorder %s2346_s3, %s1632_s25  ;;  %p1639_p10 = scmp.lt.u32.totalorder %s1632_s25, %s2346_s3 }
  0x31   : > { %p1635_p4 = pnand %p1633_p1, %p1965_p13 }
  0x33   : > { %p1636_p6 = pneg %p1635_p4 }
  0x35   : > { %p1641_p3 = pnand %p1639_p10, %p1636_p6 }
  0x37   : > { %1644 = shalt.err (!%p1641_p3)
}
  0x38   : > { %s1645_s7 = scalar_lea.vmem %s1953_s10, 128  ;;  %p1653_p12 = scmp.lt.s32.totalorder %s1953_s10, %s1953_s10 }
  0x39   : > { %p1646_p5 = scmp.ne.s32.totalorder %s1953_s10, %s1645_s7  ;;  %p1654_p0 = scmp.lt.s32.totalorder %s1645_s7, %s1645_s7 }
  0x3b   : > { %p1648_p7 = pnand %p1646_p5, %p1965_p13  ;;  %p1655_p1 = por %p1654_p0, %p1653_p12 }
  0x3d   : > { %p1649_p9 = pneg %p1648_p7 }
  0x3f   : > { %p1656_p4 = pnand %p1655_p1, %p1649_p9 }
  0x41   : > { %1659 = shalt.err (!%p1656_p4)
}
  0x42   : > { %1514 = dma.hbm_to_vmem [thread:$0]  (!%p1949_p11), %s2346_s3, 128, %s1953_s10, [#allocation11]  }
  0x43   : > { %s1660_s14 = scalar_lea.hbm %s2345_s2, 16 }
  0x44   : > { %p1661_p6 = scmp.ne.s32.totalorder %s2345_s2, %s1660_s14  ;;  %p1667_p5 = scmp.lt.u32.totalorder %s1660_s14, %s2345_s2 }
  0x46   : > { %p1663_p10 = pnand %p1661_p6, %p1965_p13 }
  0x48   : > { %p1664_p3 = pneg %p1663_p10 }
  0x4a   : > { %p1669_p7 = pnand %p1667_p5, %p1664_p3 }
  0x4c   : > { %1672 = shalt.err (!%p1669_p7)
}
  0x4d   : > { %s1673_s6 = scalar_lea.vmem %s205_s12, 16  ;;  %s1680_s10 = scalar_lea.vmem %s205_s12, 32 }
  0x4e   : > { %p1674_p9 = scmp.ne.s32.totalorder %s205_s12, %s1673_s6  ;;  %p1681_p1 = scmp.lt.s32.totalorder %s205_s12, %s205_s12 }
  0x4f   : > { %p1682_p4 = scmp.lt.s32.totalorder %s1680_s10, %s1673_s6 }
  0x50   : > { %p1676_p12 = pnand %p1674_p9, %p1965_p13 }
  0x51   : > { %p1683_p8 = por %p1682_p4, %p1681_p1 }
  0x52   : > { %p1677_p0 = pneg %p1676_p12 }
  0x54   : > { %p1684_p2 = pnand %p1683_p8, %p1677_p0 }
  0x56   : > { %1687 = shalt.err (!%p1684_p2)
}
  0x57   : > { %1511 = dma.hbm_to_vmem [thread:$0]  (!%p1949_p11), %s2345_s2, 16, %s205_s12, [#allocation8]  }
  0x58   : > { %s1843_s18 = smov [#allocation12]   ;;  %s1688_s14 = scalar_lea.hbm %s2347_s4, 16 }
  0x59   : > { %s226_s29 = sshll.u32 %s1843_s18, 4  ;;  %p1689_p6 = scmp.ne.s32.totalorder %s2347_s4, %s1688_s14  ;;  %s227_s29 = int_to_ptr.vmem [resolvable:$true] %s226_s29 }
  0x5a   : > { %p1695_p10 = scmp.lt.u32.totalorder %s1688_s14, %s2347_s4 }
  0x5b   : > { %p1691_p2 = pnand %p1689_p6, %p1965_p13 }
  0x5d   : > { %p1692_p8 = pneg %p1691_p2 }
  0x5f   : > { %p1697_p3 = pnand %p1695_p10, %p1692_p8 }
  0x61   : > { %1700 = shalt.err (!%p1697_p3)
}
  0x62   : > { %s1701_s12 = scalar_lea.vmem %s227_s29, 16  ;;  %s1708_s6 = scalar_lea.vmem %s227_s29, 32 }
  0x63   : > { %p1702_p5 = scmp.ne.s32.totalorder %s227_s29, %s1701_s12  ;;  %p1709_p12 = scmp.lt.s32.totalorder %s227_s29, %s227_s29 }
  0x64   : > { %p1710_p0 = scmp.lt.s32.totalorder %s1708_s6, %s1701_s12 }
  0x65   : > { %p1704_p7 = pnand %p1702_p5, %p1965_p13 }
  0x66   : > { %p1711_p1 = por %p1710_p0, %p1709_p12 }
  0x67   : > { %p1705_p9 = pneg %p1704_p7 }
  0x69   : > { %p1712_p4 = pnand %p1711_p1, %p1705_p9 }
  0x6b   : > { %1715 = shalt.err (!%p1712_p4)
}
  0x6c   : > { %1517 = dma.hbm_to_vmem [thread:$0]  (!%p1949_p11), %s2347_s4, 16, %s227_s29, [#allocation11]  }
  0x6d   : > { %s35_s24 = sadd.s32 1, %s1832_s22  ;;  %s44_s7 = sadd.s32 1, %s1824_s20 }
  0x6e   : > { %p37_p13 = scmp.ge.s32.totalorder %s35_s24, 2  ;;  %p51_p6 = scmp.ne.s32.totalorder %s1824_s20, %s1820_s19 }
  0x6f   : > { %p52_p2 = scmp.eq.s32.totalorder %s1836_s23, 0  ;;  %p1530_p8 = scmp.lt.s32.totalorder %s1836_s23, 2 }
  0x70   : > { %s2380_s24 = smov (%p37_p13, %s35_s24), 0  ;;  %p2364_p3 = scmp.ne.s32.totalorder %s2357_s27, 0 }
  0x71   : > { %p53_p10 = por %p52_p2, %p51_p6  ;;  %s39_s18 = ssub.s32 %s1832_s22, %s2380_s24 }
  0x72   : > { %p2056_p5 = por %p2364_p3, %p51_p6  ;;  %s237_s11 = sand.u32 1, %s1824_s20  }
  0x73   : > { %p42_p7 = scmp.eq.s32.totalorder %s39_s18, 0  ;;  %s1438_s29 = sshll.u32 %s237_s11, 6 }
  0x74   : > { %s1455_s13 = sshll.u32 %s1832_s22, 10  ;;  %s241_s27 = scalar_lea.vmem [#allocation4], %s1438_s29 }
  0x75   : > { %s2065_s14 = scalar_select %p42_p7, %s1824_s20, %s44_s7  }
  0x76   : > { %s2070_s17 = scalar_lea.hbm %s2343_s0, %s1455_s13  ;;  %s250_s25 = sshll.u32 %s241_s27, 4  ;;  %s2078_s25 = int_to_ptr.vmem [resolvable:$true] %s250_s25 }
  0x77   : > { %p2074_p11 = pnand %p1530_p8, %p53_p10  ;;  %s2080_s6 = scalar_lea.sflag [#allocation5], %s237_s11 }
  0x78   : > { %s1716_s10 = scalar_lea.hbm %s2070_s17, 1024  ;;  %s1721_s18 = scalar_lea.hbm %s2343_s0, 2048 }
  0x79   : > { %p1717_p9 = scmp.ne.s32.totalorder %s2070_s17, %s1716_s10  ;;  %p1718_p12 = pneg %p2074_p11 }
  0x7a   : > { %p1722_p4 = scmp.lt.u32.totalorder %s2070_s17, %s2343_s0  ;;  %p1723_p13 = scmp.lt.u32.totalorder %s1721_s18, %s1716_s10 }
  0x7b   : > { %p1719_p0 = pnand %p1718_p12, %p1717_p9  ;;  %p1725_p2 = scmp.lt.u32.totalorder %s1716_s10, %s2070_s17 }
  0x7c   : > { %p1724_p6 = por %p1723_p13, %p1722_p4 }
  0x7d   : > { %p1720_p1 = pneg %p1719_p0 }
  0x7e   : > { %p1726_p8 = por %p1725_p2, %p1724_p6 }
  0x80   : > { %p1727_p10 = pnand %p1726_p8, %p1720_p1 }
  0x82   : > { %1730 = shalt.err (!%p1727_p10)
}
  0x83   : > { %s1731_s11 = scalar_lea.vmem %s2078_s25, 1024  ;;  %s1844_s15 = smov [#allocation4]  }
  0x84   : > { %p1732_p3 = scmp.ne.s32.totalorder %s2078_s25, %s1731_s11  ;;  %s1736_s16 = sshll.u32 %s1844_s15, 4  ;;  %s1737_s16 = int_to_ptr.vmem [resolvable:$false] %s1736_s16 }
  0x85   : > { %s1738_s27 = scalar_lea.vmem %s1737_s16, 2048  ;;  %p1739_p0 = scmp.lt.s32.totalorder %s2078_s25, %s1737_s16 }
  0x86   : > { %p1734_p7 = pnand %p1732_p3, %p1718_p12  ;;  %p1740_p4 = scmp.lt.s32.totalorder %s1738_s27, %s1731_s11 }
  0x88   : > { %p1735_p9 = pneg %p1734_p7  ;;  %p1741_p13 = por %p1740_p4, %p1739_p0 }
  0x8a   : > { %p1742_p6 = pnand %p1741_p13, %p1735_p9 }
  0x8c   : > { %1745 = shalt.err (!%p1742_p6)
}
  0x8d   : > { %s1845_s10 = smov 256   ;;  %s1846_s9 = smov 16  }
  0x8e   : > { %1521 = dma.hbm_to_vmem [thread:$0]  (!%p2074_p11), %s2070_s17, 1024, %s2078_s25, %s2080_s6, %s1845_s10, %s1845_s10, %s1846_s9  }
  0x8f   : > { %p2367_p12 = scmp.ne.s32.totalorder %s2361_s30, 0 }
  0x90   : > { %s2111_s7 = sand.u32 (!%p2367_p12), 1, %s1820_s19   ;;  %p2368_p1 = scmp.ne.s32.totalorder (!%p2367_p12), %s2358_s28, 0 }
  0x91   : > { %262 = sbr.rel (%p2367_p12) target bundleno = 972 (0x3cc), region = 40  ;;  %s1442_s18 = sshll.u32 (!%p2367_p12), %s2111_s7, 6 }
  0x92   : > { %s265_s29 = scalar_lea.sflag (!%p2367_p12), [#allocation5], %s2111_s7  ;;  %s268_s13 = scalar_lea.vmem (!%p2367_p12), [#allocation4], %s1442_s18 }
  0x98   : > { %1799 = dma.done.wait (%p2368_p1), %s265_s29, 1024  }
  0x99   : > { %1801 = vsyncadd (%p2368_p1), %s265_s29, 4294966272  ;;  %p2369_p2 = scmp.ne.s32.totalorder %s2356_s26, 0 }
  0x9b   : > { %1803 = dma.done.wait (%p2369_p2), [#allocation8], 528  }
  0x9c   : > { %1805 = vsyncadd (%p2369_p2), [#allocation8], 4294966768 }
  0x9d   : > { %1807 = dma.done.wait (%p2369_p2), [#allocation11], 144  }
  0x9e   : > { %1809 = vsyncadd (%p2369_p2), [#allocation11], 4294967152  ;;  %v318_v0 = vld [vmem:[%s268_s13] sm:$0xff]  ;;  %v319_v1 = vld [vmem:[%s268_s13 + $0x8] sm:$0xff]  ;;  %v1847_v16 = vmov 0   ;;  %v343_v17 = vlaneseq  ;;  %vm315_vm0 = vcmask 253952  }
  0x9f   : > { %v320_v2 = vld [vmem:[%s268_s13 + $0x10] sm:$0xff]  ;;  %v327_v3 = vadd.f32 %v319_v1, %v318_v0  ;;  %v321_v4 = vld [vmem:[%s268_s13 + $0x18] sm:$0xff]  ;;  %v322_v5 = vld [vmem:[%s268_s13 + $0x20] sm:$0xff]  ;;  %v725_v12 = vmax.f32 %v318_v0, %v319_v1  ;;  %1598 = vset.pattern.permute.xlu0 %v1847_v16  ;;  %1599 = vset.pattern.permute.xlu1 %v1847_v16  ;;  %v1848_v18 = vmov 1966171168   ;;  %vm1852_vm1 = vmmov 0  }
  0xa0   : > { %v323_v6 = vld [vmem:[%s268_s13 + $0x28] sm:$0xff]  ;;  %v324_v8 = vld [vmem:[%s268_s13 + $0x30] sm:$0xff]  ;;  %v325_v9 = vld [vmem:[%s268_s13 + $0x38] sm:$0xff]  ;;  %v330_v10 = vadd.f32 %v321_v4, %v320_v2  ;;  %v728_v13 = vmax.f32 %v320_v2, %v321_v4  ;;  %v476_v19 = vunpack.c.l.s4 %v1848_v18  ;;  %v2128_v20 = vshrl.u32 %v343_v17, 7  ;;  %s1452_s26 = sshll.u32 %s1828_s21, 4  ;;  %s309_s28 = scalar_lea.vmem [#allocation13], %s2111_s7 }
  0xa1   : > { %v333_v7 = vadd.f32 %v323_v6, %v322_v5  ;;  %328 = vadd.xlane.f32.xlu0 %v327_v3  ;;  %v336_v11 = vadd.f32 %v325_v9, %v324_v8  ;;  %v731_v14 = vmax.f32 %v322_v5, %v323_v6  ;;  %v734_v15 = vmax.f32 %v324_v8, %v325_v9  ;;  %s1315_s30 = sshll.u32 %s309_s28, 4  ;;  %s2293_s12 = scalar_lea.hbm %s2348_s5, %s1452_s26  ;;  %s2295_s30 = int_to_ptr.vmem [resolvable:$true] %s1315_s30 }
  0xa2   : > { %v477_v21 = vunpack.c.0.s8 %v476_v19  ;;  %v2131_v22 = vsub.s32 0, %v2128_v20  ;;  %v2134_v23 = vsub.s32 1, %v2128_v20  ;;  %v2137_v24 = vsub.s32 2, %v2128_v20  ;;  %s1303_s6 = scalar_lea.sflag [#allocation6], %s2111_s7  ;;  %s1746_s11 = scalar_lea.vmem %s2295_s30, 16 }
  0xa3   : > { %334 = vadd.xlane.f32.xlu1 %v333_v7  ;;  %v2140_v25 = vsub.s32 3, %v2128_v20  ;;  %v2143_v26 = vsub.s32 4, %v2128_v20  ;;  %v2146_v27 = vsub.s32 5, %v2128_v20  ;;  %v2149_v28 = vsub.s32 6, %v2128_v20  ;;  %p1747_p11 = scmp.ne.s32.totalorder %s2295_s30, %s1746_s11  ;;  %s1853_s21 = smov [#allocation13]  }
  0xa4   : > { %v2152_v29 = vsub.s32 7, %v2128_v20  ;;  %v2155_v31 = vsub.s32 %v477_v21, %v2128_v20  ;;  %vm690_vm2 = vcmask 130112   ;;  %vm697_vm3 = vcmask 195712   ;;  %s1750_s15 = sshll.u32 %s1853_s21, 4  ;;  %s1751_s15 = int_to_ptr.vmem [resolvable:$false] %s1750_s15 }
  0xa5   : > { %331 = vadd.xlane.f32.xlu0 %v330_v10  ;;  %vm704_vm4 = vcmask 261312   ;;  %vm1125_vm5 = vcmask 1040384   ;;  %vm1140_vm6 = vcmask 261120   ;;  %vm1215_vm7 = vcmask 64512   ;;  %p1748_p8 = pnand %p1747_p11, %p2056_p5  ;;  %s1752_s16 = scalar_lea.vmem %s1751_s15, 32 }
  0xa6   : > { %p1753_p3 = scmp.lt.s32.totalorder %s2295_s30, %s1751_s15  ;;  %p1754_p7 = scmp.lt.s32.totalorder %s1752_s16, %s1746_s11 }
  0xa7   : > { %337 = vadd.xlane.f32.xlu1 %v336_v11  ;;  %p1749_p10 = pneg %p1748_p8 }
  0xa8   : > { %p1755_p9 = por %p1754_p7, %p1753_p3 }
  0xa9   : > { %726 = vmax.xlane.f32.xlu0 %v725_v12 }
  0xaa   : > { %p1756_p0 = pnand %p1755_p9, %p1749_p10 }
  0xab   : > { %729 = vmax.xlane.f32.xlu1 %v728_v13 }
  0xad   : > { %732 = vmax.xlane.f32.xlu0 %v731_v14 }
  0xaf   : > { %735 = vmax.xlane.f32.xlu1 %v734_v15 }
 0x12e   : > { %v329_v30 = vpop.xlane.xlu0 %328 }
 0x12f   : > { %v346_v33 = vrot.slane %v329_v30, %v2131_v22  ;;  %v350_v34 = vrot.slane %v329_v30, %v2134_v23  ;;  %v354_v35 = vrot.slane %v329_v30, %v2137_v24  ;;  %v358_v36 = vrot.slane %v329_v30, %v2140_v25 }
 0x130   : > { %v335_v32 = vpop.xlane.xlu1 %334  ;;  %v362_v37 = vrot.slane %v329_v30, %v2143_v26  ;;  %v366_v38 = vrot.slane %v329_v30, %v2146_v27  ;;  %v370_v39 = vrot.slane %v329_v30, %v2149_v28  ;;  %v374_v40 = vrot.slane %v329_v30, %v2152_v29 }
 0x131   : > { %v471_v41 = vcombine.low %v346_v33, %v350_v34  ;;  %v472_v42 = vcombine.low %v354_v35, %v358_v36  ;;  %v410_v43 = vrot.slane %v335_v32, %v2131_v22  ;;  %v414_v44 = vrot.slane %v335_v32, %v2134_v23 }
 0x132   : > { %v332_v45 = vpop.xlane.xlu0 %331  ;;  %v473_v46 = vcombine.low %v362_v37, %v366_v38  ;;  %v474_v47 = vcombine.low %v370_v39, %v374_v40  ;;  %v418_v48 = vrot.slane %v335_v32, %v2137_v24  ;;  %v422_v49 = vrot.slane %v335_v32, %v2140_v25 }
 0x133   : > { %v481_v50 = vrot.slane %v471_v41, %v2155_v31  ;;  %v488_v51 = vrot.slane %v472_v42, %v2155_v31  ;;  %v378_v52 = vrot.slane %v332_v45, %v2131_v22  ;;  %v382_v53 = vrot.slane %v332_v45, %v2134_v23 }
 0x134   : > { %v495_v54 = vrot.slane %v473_v46, %v2155_v31  ;;  %v502_v55 = vrot.slane %v474_v47, %v2155_v31  ;;  %v386_v56 = vrot.slane %v332_v45, %v2137_v24  ;;  %v390_v57 = vrot.slane %v332_v45, %v2140_v25  ;;  %v338_v6 = vpop.xlane.xlu1 %337 }
 0x135   : > { %v503_v58 = vcombine.low %v481_v50, %v488_v51  ;;  %v394_v59 = vrot.slane %v332_v45, %v2143_v26  ;;  %v398_v60 = vrot.slane %v332_v45, %v2146_v27  ;;  %v402_v61 = vrot.slane %v332_v45, %v2149_v28 }
 0x136   : > { %v504_v62 = vcombine.low %v495_v54, %v502_v55  ;;  %v406_v63 = vrot.slane %v332_v45, %v2152_v29  ;;  %v520_v0 = vcombine.low %v378_v52, %v382_v53  ;;  %v521_v1 = vcombine.low %v386_v56, %v390_v57  ;;  %v727_v42 = vpop.xlane.xlu0 %726 }
 0x137   : > { %v511_v2 = vrot.slane %v503_v58, %v2155_v31  ;;  %v522_v3 = vcombine.low %v394_v59, %v398_v60  ;;  %v426_v4 = vrot.slane %v335_v32, %v2143_v26  ;;  %v430_v5 = vrot.slane %v335_v32, %v2146_v27 }
 0x138   : > { %v518_v7 = vrot.slane %v504_v62, %v2155_v31  ;;  %v523_v8 = vcombine.low %v402_v61, %v406_v63  ;;  %v530_v9 = vrot.slane %v520_v0, %v2155_v31  ;;  %v537_v10 = vrot.slane %v521_v1, %v2155_v31  ;;  %v730_v59 = vpop.xlane.xlu1 %729 }
 0x139   : > { %v544_v11 = vrot.slane %v522_v3, %v2155_v31  ;;  %v434_v12 = vrot.slane %v335_v32, %v2149_v28  ;;  %v438_v13 = vrot.slane %v335_v32, %v2152_v29  ;;  %v569_v14 = vcombine.low %v410_v43, %v414_v44 }
 0x13a   : > { %v519_v15 = vcombine.low %v511_v2, %v518_v7  ;;  %v551_v16 = vrot.slane %v523_v8, %v2155_v31  ;;  %v552_v18 = vcombine.low %v530_v9, %v537_v10  ;;  %v570_v19 = vcombine.low %v418_v48, %v422_v49 }
 0x13b   : > { %v571_v21 = vcombine.low %v426_v4, %v430_v5  ;;  %v572_v30 = vcombine.low %v434_v12, %v438_v13  ;;  %v579_v33 = vrot.slane %v569_v14, %v2155_v31  ;;  %v442_v34 = vrot.slane %v338_v6, %v2131_v22 }
 0x13c   : > { %668 = vperm.xlu0 %1598, %v519_v15   ;;  %v553_v35 = vcombine.low %v544_v11, %v551_v16  ;;  %v560_v36 = vrot.slane %v552_v18, %v2155_v31  ;;  %v586_v37 = vrot.slane %v570_v19, %v2155_v31  ;;  %v446_v32 = vrot.slane %v338_v6, %v2134_v23 }
 0x13d   : > { %v593_v38 = vrot.slane %v571_v21, %v2155_v31  ;;  %v600_v39 = vrot.slane %v572_v30, %v2155_v31  ;;  %v450_v40 = vrot.slane %v338_v6, %v2137_v24  ;;  %v454_v41 = vrot.slane %v338_v6, %v2140_v25  ;;  %v733_v30 = vpop.xlane.xlu0 %732 }
 0x13e   : > { %v567_v43 = vrot.slane %v553_v35, %v2155_v31  ;;  %v601_v44 = vcombine.low %v579_v33, %v586_v37  ;;  %v458_v45 = vrot.slane %v338_v6, %v2143_v26  ;;  %v462_v46 = vrot.slane %v338_v6, %v2146_v27 }
 0x13f   : > { %v602_v47 = vcombine.low %v593_v38, %v600_v39  ;;  %v466_v48 = vrot.slane %v338_v6, %v2149_v28  ;;  %v470_v49 = vrot.slane %v338_v6, %v2152_v29  ;;  %v618_v50 = vcombine.low %v442_v34, %v446_v32 }
 0x140   : > { %v568_v51 = vcombine.low %v560_v36, %v567_v43  ;;  %v609_v52 = vrot.slane %v601_v44, %v2155_v31  ;;  %v619_v53 = vcombine.low %v450_v40, %v454_v41  ;;  %v620_v54 = vcombine.low %v458_v45, %v462_v46 }
 0x141   : > { %v616_v55 = vrot.slane %v602_v47, %v2155_v31  ;;  %v621_v56 = vcombine.low %v466_v48, %v470_v49  ;;  %v628_v57 = vrot.slane %v618_v50, %v2155_v31  ;;  %v744_v58 = vrot.slane %v727_v42, %v2131_v22 }
 0x142   : > { %671 = vperm.xlu1 %1599, %v568_v51   ;;  %v635_v60 = vrot.slane %v619_v53, %v2155_v31  ;;  %v642_v61 = vrot.slane %v620_v54, %v2155_v31  ;;  %v748_v62 = vrot.slane %v727_v42, %v2134_v23  ;;  %v752_v63 = vrot.slane %v727_v42, %v2137_v24 }
 0x143   : > { %v617_v0 = vcombine.low %v609_v52, %v616_v55  ;;  %v649_v1 = vrot.slane %v621_v56, %v2155_v31  ;;  %v756_v2 = vrot.slane %v727_v42, %v2140_v25  ;;  %v760_v3 = vrot.slane %v727_v42, %v2143_v26  ;;  %v736_v52 = vpop.xlane.xlu1 %735 }
 0x144   : > { %v650_v4 = vcombine.low %v628_v57, %v635_v60  ;;  %v764_v5 = vrot.slane %v727_v42, %v2146_v27  ;;  %v768_v6 = vrot.slane %v727_v42, %v2149_v28  ;;  %v772_v7 = vrot.slane %v727_v42, %v2152_v29 }
 0x145   : > { %v651_v8 = vcombine.low %v642_v61, %v649_v1  ;;  %v869_v9 = vcombine.low %v744_v58, %v748_v62  ;;  %v870_v10 = vcombine.low %v752_v63, %v756_v2  ;;  %v776_v11 = vrot.slane %v730_v59, %v2131_v22 }
 0x146   : > { %674 = vperm.xlu1 %1599, %v617_v0   ;;  %v658_v12 = vrot.slane %v650_v4, %v2155_v31  ;;  %v871_v13 = vcombine.low %v760_v3, %v764_v5  ;;  %v872_v14 = vcombine.low %v768_v6, %v772_v7  ;;  %v780_v15 = vrot.slane %v730_v59, %v2134_v23 }
 0x147   : > { %v665_v16 = vrot.slane %v651_v8, %v2155_v31  ;;  %v879_v18 = vrot.slane %v869_v9, %v2155_v31  ;;  %v886_v19 = vrot.slane %v870_v10, %v2155_v31  ;;  %v784_v21 = vrot.slane %v730_v59, %v2137_v24 }
 0x148   : > { %v893_v33 = vrot.slane %v871_v13, %v2155_v31  ;;  %v900_v34 = vrot.slane %v872_v14, %v2155_v31  ;;  %v788_v35 = vrot.slane %v730_v59, %v2140_v25  ;;  %v792_v36 = vrot.slane %v730_v59, %v2143_v26 }
 0x149   : > { %v666_v37 = vcombine.low %v658_v12, %v665_v16  ;;  %v901_v32 = vcombine.low %v879_v18, %v886_v19  ;;  %v796_v38 = vrot.slane %v730_v59, %v2146_v27  ;;  %v800_v39 = vrot.slane %v730_v59, %v2149_v28 }
 0x14a   : > { %v902_v40 = vcombine.low %v893_v33, %v900_v34  ;;  %v804_v41 = vrot.slane %v730_v59, %v2152_v29  ;;  %v918_v42 = vcombine.low %v776_v11, %v780_v15  ;;  %v919_v43 = vcombine.low %v784_v21, %v788_v35 }
 0x14b   : > { %677 = vperm.xlu1 %1599, %v666_v37   ;;  %v909_v44 = vrot.slane %v901_v32, %v2155_v31  ;;  %v920_v45 = vcombine.low %v792_v36, %v796_v38  ;;  %v808_v46 = vrot.slane %v733_v30, %v2131_v22  ;;  %v812_v47 = vrot.slane %v733_v30, %v2134_v23 }
 0x14c   : > { %v916_v48 = vrot.slane %v902_v40, %v2155_v31  ;;  %v921_v49 = vcombine.low %v800_v39, %v804_v41  ;;  %v928_v50 = vrot.slane %v918_v42, %v2155_v31  ;;  %v935_v51 = vrot.slane %v919_v43, %v2155_v31  ;;  %v1127_v42 = vld [vmem:[#allocation7] sm:$0xff]  ;;  %v1128_v43 = vld [vmem:[#allocation7 + $0x8] sm:$0xff] }
 0x14d   : > { %v942_v53 = vrot.slane %v920_v45, %v2155_v31  ;;  %v816_v54 = vrot.slane %v733_v30, %v2137_v24  ;;  %v820_v55 = vrot.slane %v733_v30, %v2140_v25  ;;  %v824_v56 = vrot.slane %v733_v30, %v2143_v26  ;;  %v1129_v45 = vld [vmem:[#allocation7 + $0x10] sm:$0xff] }
 0x14e   : > { %v917_v57 = vcombine.low %v909_v44, %v916_v48  ;;  %v949_v58 = vrot.slane %v921_v49, %v2155_v31  ;;  %v950_v59 = vcombine.low %v928_v50, %v935_v51  ;;  %v828_v60 = vrot.slane %v733_v30, %v2146_v27 }
 0x14f   : > { %v832_v61 = vrot.slane %v733_v30, %v2149_v28  ;;  %v836_v62 = vrot.slane %v733_v30, %v2152_v29  ;;  %v967_v63 = vcombine.low %v808_v46, %v812_v47  ;;  %v968_v0 = vcombine.low %v816_v54, %v820_v55  ;;  %v1130_v46 = vld [vmem:[#allocation7 + $0x18] sm:$0xff] }
 0x150   : > { %1066 = vperm.xlu1 %1599, %v917_v57   ;;  %v951_v1 = vcombine.low %v942_v53, %v949_v58  ;;  %v958_v2 = vrot.slane %v950_v59, %v2155_v31  ;;  %v969_v3 = vcombine.low %v824_v56, %v828_v60  ;;  %v840_v4 = vrot.slane %v736_v52, %v2131_v22 }
 0x151   : > { %v970_v5 = vcombine.low %v832_v61, %v836_v62  ;;  %v977_v6 = vrot.slane %v967_v63, %v2155_v31  ;;  %v984_v7 = vrot.slane %v968_v0, %v2155_v31  ;;  %v844_v8 = vrot.slane %v736_v52, %v2134_v23 }
 0x152   : > { %v965_v9 = vrot.slane %v951_v1, %v2155_v31  ;;  %v991_v10 = vrot.slane %v969_v3, %v2155_v31  ;;  %v848_v11 = vrot.slane %v736_v52, %v2137_v24  ;;  %v852_v12 = vrot.slane %v736_v52, %v2140_v25 }
 0x153   : > { %v998_v13 = vrot.slane %v970_v5, %v2155_v31  ;;  %v999_v14 = vcombine.low %v977_v6, %v984_v7  ;;  %v856_v22 = vrot.slane %v736_v52, %v2143_v26  ;;  %v860_v15 = vrot.slane %v736_v52, %v2146_v27 }
 0x154   : > { %v966_v16 = vcombine.low %v958_v2, %v965_v9  ;;  %v864_v18 = vrot.slane %v736_v52, %v2149_v28  ;;  %v868_v23 = vrot.slane %v736_v52, %v2152_v29  ;;  %v1016_v19 = vcombine.low %v840_v4, %v844_v8 }
 0x155   : > { %v1000_v21 = vcombine.low %v991_v10, %v998_v13  ;;  %v1007_v30 = vrot.slane %v999_v14, %v2155_v31  ;;  %v1017_v33 = vcombine.low %v848_v11, %v852_v12  ;;  %v1018_v24 = vcombine.low %v856_v22, %v860_v15 }
 0x156   : > { %1069 = vperm.xlu1 %1599, %v966_v16   ;;  %v1019_v25 = vcombine.low %v864_v18, %v868_v23  ;;  %v1026_v34 = vrot.slane %v1016_v19, %v2155_v31  ;;  %v1849_v38 = vmov 0.0   ;;  %v1850_v41 = vmov -inf  }
 0x157   : > { %v1014_v35 = vrot.slane %v1000_v21, %v2155_v31  ;;  %v1033_v26 = vrot.slane %v1017_v33, %v2155_v31  ;;  %v1040_v27 = vrot.slane %v1018_v24, %v2155_v31  ;;  %316 = vst.msk [vmem:[#allocation2] sm:$0x1] %vm315_vm0, %v1849_v38  ;;  %1474 = vmatprep.subr.mxu1 %v1849_v38  ;;  %317 = vst.msk [vmem:[#allocation3] sm:$0x1] %vm315_vm0, %v1850_v41  ;;  %v1851_v47 = vmov 0.0|0.0  }
 0x158   : > { %v1047_v28 = vrot.slane %v1019_v25, %v2155_v31  ;;  %v1480_v44 = vpack.c.bf16 %v1128_v43, %v1127_v42  ;;  %1479 = vmatprep.subr.bf16.mxu0 %v1851_v47  ;;  %1471 = vmatprep.mubr.msk.f32.mxu0 %vm1852_vm1, %v1849_v38  ;;  %v1483_v48 = vpack.c.bf16 %v1130_v46, %v1129_v45  ;;  %v680_v49 = vand.u32 127, %v343_v17  ;;  %v1132_v25 = vld [vmem:[#allocation10] sm:$0xff] }
 0x159   : > { %v1015_v36 = vcombine.low %v1007_v30, %v1014_v35  ;;  %v1048_v29 = vcombine.low %v1026_v34, %v1033_v26  ;;  %1476 = vmatprep.mubr.msk.f32.mxu1 %vm1852_vm1, %v1849_v38  ;;  %1475 = vmatpush3.msra.mxu1 %v1132_v25  ;;  %v1448_v34 = vld [vmem:[#allocation9] ss:$0 sm:$0xff] }
 0x15a   : > { %v1049_v37 = vcombine.low %v1040_v27, %v1047_v28  ;;  %1481 = vmatpush3.bf16.msra.mxu0 %v1480_v44  ;;  %v685_v50 = vadd.s32 4294967288, %v680_v49  ;;  %v692_v51 = vadd.s32 4294967280, %v680_v49  ;;  %v699_v54 = vadd.s32 4294967272, %v680_v49  ;;  %v1133_v28 = vld [vmem:[#allocation12] sm:$0x1] }
 0x15b   : > { %1072 = vperm.xlu1 %1599, %v1015_v36   ;;  %v1056_v32 = vrot.slane %v1048_v29, %v2155_v31  ;;  %1482 = vmatprep.subr.bf16.mxu0 %v1851_v47  ;;  %v683_v56 = vsub.s32 %v680_v49, %v2128_v20 }
 0x15c   : > { %v1063_v39 = vrot.slane %v1049_v37, %v2155_v31  ;;  %v688_v53 = vsub.s32 %v685_v50, %v2128_v20  ;;  %v695_v55 = vsub.s32 %v692_v51, %v2128_v20  ;;  %v702_v60 = vsub.s32 %v699_v54, %v2128_v20 }
 0x15d   : > { %v1293_v37 = vmul.f32 2.0, %v1133_v28 }
 0x15e   : > { %v1064_v40 = vcombine.low %v1056_v32, %v1063_v39  ;;  %1484 = vmatpush3.bf16.msra.mxu0 %v1483_v48  ;;  %v326_v5 = vld [vmem:[#allocation2] sm:$0x1]  ;;  %v724_v18 = vld [vmem:[#allocation3] sm:$0x1] }
 0x160   : > { %1075 = vperm.xlu1 %1599, %v1064_v40  }
 0x1bb   : > { %v669_v58 = vpop.permute.xlu0 %668 }
 0x1bc   : > { %v684_v62 = vrot.slane %v669_v58, %v683_v56 }
 0x1c1   : > { %v672_v52 = vpop.permute.xlu1 %671 }
 0x1c2   : > { %v689_v59 = vrot.slane %v672_v52, %v688_v53 }
 0x1c4   : > { %v691_v63 = vsel %vm690_vm2, %v689_v59, %v684_v62 }
 0x1c5   : > { %v675_v57 = vpop.permute.xlu1 %674 }
 0x1c6   : > { %v696_v61 = vrot.slane %v675_v57, %v695_v55 }
 0x1c8   : > { %v698_v1 = vsel %vm697_vm3, %v696_v61, %v691_v63 }
 0x1ca   : > { %v678_v17 = vpop.permute.xlu1 %677 }
 0x1cb   : > { %v703_v0 = vrot.slane %v678_v17, %v702_v60 }
 0x1cd   : > { %v705_v2 = vsel %vm704_vm4, %v703_v0, %v698_v1 }
 0x1ce   : > { %v712_v3 = vrot.slane %v705_v2, %v2155_v31 }
 0x1cf   : > { %v1067_v4 = vpop.permute.xlu1 %1066 }
 0x1d0   : > { %v719_v6 = vrot.slane %v712_v3, %v2155_v31  ;;  %v1080_v11 = vrot.slane %v1067_v4, %v683_v56 }
 0x1d2   : > { %v721_v20 = vadd.f32 %v719_v6, %v326_v5 }
 0x1d4   : > { %723 = vst.msk [vmem:[#allocation2] sm:$0x1] %vm315_vm0, %v721_v20 }
 0x1d5   : > { %v1070_v7 = vpop.permute.xlu1 %1069 }
 0x1d6   : > { %v1084_v9 = vrot.slane %v1070_v7, %v688_v53 }
 0x1d8   : > { %v1085_v13 = vsel %vm690_vm2, %v1084_v9, %v1080_v11 }
 0x1da   : > { %v1073_v8 = vpop.permute.xlu1 %1072 }
 0x1db   : > { %v1089_v10 = vrot.slane %v1073_v8, %v695_v55  ;;  %v1116_v21 = vld [vmem:[#allocation2] sm:$0x1] }
 0x1dc   : > { %v1117_v30 = vmul.f32 0.00390625, %v1116_v21 }
 0x1dd   : > { %v1090_v22 = vsel %vm697_vm3, %v1089_v10, %v1085_v13 }
 0x1df   : > { %v1076_v12 = vpop.permute.xlu1 %1075 }
 0x1e0   : > { %v1094_v14 = vrot.slane %v1076_v12, %v702_v60 }
 0x1e2   : > { %v1095_v15 = vsel %vm704_vm4, %v1094_v14, %v1090_v22 }
 0x1e3   : > { %v1102_v16 = vrot.slane %v1095_v15, %v2155_v31 }
 0x1e5   : > { %v1109_v23 = vrot.slane %v1102_v16, %v2155_v31 }
 0x1e7   : > { %v1111_v19 = vmax.f32 %v724_v18, %v1109_v23 }
 0x1e9   : > { %1112 = vst.msk [vmem:[#allocation3] sm:$0x1] %vm315_vm0, %v1111_v19 }
 0x1f0   : > { %v1447_v33 = vld [vmem:[#allocation3] ss:$0 sm:$0xff] }
 0x1f1   : > { %v1126_v24 = vsel %vm1125_vm5, %v1117_v30, %v1447_v33 }
 0x1f2   : > { %1472 = vmatmul.mubr.msk.f32.vlgmr.msra.gmra.mrb[0].mxu0 %vm1140_vm6, %v1126_v24 }
 0x2c5   : > { %v1210_v35 = vpop.f32.mrb[0].mxu0 }
 0x2c6   : > { %v1211_v26 = vadd.f32 %v1448_v34, %v1210_v35  ;;  %v1473_v27 = vpop.f32.mrb[1].mxu0 }
 0x2c8   : > { %v1214_v31 = vmax.f32 %v1211_v26, 0.0 }
 0x2ca   : > { %1477 = vmatmul.mubr.msk.f32.vlgmr.msra.gmra.mrb[0].mxu1 %vm1215_vm7, %v1214_v31 }
 0x39d   : > { %v1285_v36 = vpop.f32.mrb[0].mxu1 }
 0x39e   : > { %v1290_v29 = vrot.slane %v1285_v36, 1  ;;  %v1478_v32 = vpop.f32.mrb[1].mxu1 }
 0x3a0   : > { %v1292_v38 = vadd.f32 %v1290_v29, %v1285_v36 }
 0x3a2   : > { %v1294_v39 = vadd.f32 %v1293_v37, %v1292_v38 }
 0x3a4   : > { %v1451_v40 = vmul.f32 -1.442695, %v1294_v39 }
 0x3a6   : > { %1600 = vpow2.f32 %v1451_v40 }
 0x3b0   : > { %v1601_v41 = vpop.eup %1600 }
 0x3b1   : > { %v1298_v42 = vadd.f32 1.0, %v1601_v41 }
 0x3b3   : > { %1602 = vrcp.f32 %v1298_v42 }
 0x3bd   : > { %v1603_v43 = vpop.eup %1602 }
 0x3be   : > { %1301 = vst.msk [vmem:[%s309_s28] sm:$0x1] %vm315_vm0, %v1603_v43 }
 0x3bf   : > { %1759 = shalt.err (!%p1756_p0)
}
 0x3c0   : > { %s1760_s27 = scalar_lea.hbm %s2293_s12, 16  ;;  %s1764_s7 = scalar_lea.hbm %s2348_s5, 32 }
 0x3c1   : > { %p1761_p4 = scmp.ne.s32.totalorder %s2293_s12, %s1760_s27  ;;  %p1765_p12 = scmp.lt.u32.totalorder %s2293_s12, %s2348_s5 }
 0x3c2   : > { %p1766_p1 = scmp.lt.u32.totalorder %s1764_s7, %s1760_s27  ;;  %p1768_p11 = scmp.lt.u32.totalorder %s1760_s27, %s2293_s12 }
 0x3c3   : > { %p1762_p13 = pnand %p1761_p4, %p2056_p5 }
 0x3c4   : > { %p1767_p2 = por %p1766_p1, %p1765_p12 }
 0x3c5   : > { %p1763_p6 = pneg %p1762_p13 }
 0x3c6   : > { %p1769_p8 = por %p1768_p11, %p1767_p2 }
 0x3c8   : > { %p1770_p10 = pnand %p1769_p8, %p1763_p6 }
 0x3ca   : > { %1773 = shalt.err (!%p1770_p10)
}
 0x3cb   : > { %1503 = dma.vmem_to_hbm [thread:$0]  (%p2056_p5), %s2295_s30, 16, %s2293_s12, %s1303_s6  }
 0x3cc PF: > { %s2370_s13 = sld [smem:[#allocation18_spill]]  ;;  %s2371_s26 = sld [smem:[#allocation19_spill]] }
 0x3cd   : > { %p2373_p7 = scmp.ge.s32.totalorder %s1836_s23, 2 }
 0x3d2   : > { %s1327_s28 = sand.u32 1, %s2370_s13   ;;  %p2372_p3 = scmp.ne.s32.totalorder %s2371_s26, 0 }
 0x3d3   : > { %s1328_s17 = scalar_lea.sflag [#allocation6], %s1327_s28 }
 0x3d4   : > { %p1523_p9 = pnand %p2373_p7, %p2372_p3 }
 0x3d6   : > { %1811 = dma.done.wait (!%p1523_p9), %s1328_s17, 16  }
 0x3d7   : > { %1813 = vsyncadd (!%p1523_p9), %s1328_s17, 4294967280  ;;  %s23_s23 = sadd.s32 1, %s1836_s23   ;;  %s2374_s18 = smov %s1820_s19 }
 0x3d8   : > { %p20_p0 = scmp.ge.s32.totalorder %s23_s23, 4   ;;  %s2375_s19 = smov %s1824_s20 }
 0x3d9   : > { %s2376_s20 = smov %s2065_s14  ;;  %s2377_s21 = smov %s1832_s22 }
 0x3da   : > { %s2378_s22 = smov %s2380_s24  ;;  %22 = sbr.rel (!%p20_p0) target bundleno = 8 (0x8), region = 109 }
 0x3e1   :  { %1332 = vsyncpa [#allocation5], 1 }
 0x3e2   :  { %1334 = vsyncpa [#allocation5 + $0x1], 1 }
 0x3e3   :  { %1335 = vsyncpa [#allocation8], 1 }
 0x3e4   :  { %1336 = vsyncpa [#allocation11], 1 }
 0x3e5   :  { %1337 = vsyncpa [#allocation6], 1 }
 0x3e6   :  { %1339 = vsyncpa [#allocation6 + $0x1], 1 }

</bundles_post_ra>
